<compile_context>
chip_gen: v7x
topology: tpu7x:2x2x1
jax: 0.10.0
libtpu: 0.0.40
codegen_flags: <defaults>
</compile_context>

<pallas_src>
import math
from functools import partial

import jax
import jax.numpy as jnp
from jax.experimental import pallas as pl
from jax.experimental.pallas import tpu as pltpu


def _round_up(x, m):
    return ((x + m - 1) // m) * m


# ----------------------------------------------------------------------------
# Kernel 1: row-tiled linear with bias (gat_linear on the query vector)
# ----------------------------------------------------------------------------
def _linear_bias_kernel(x_ref, w_ref, b_ref, o_ref):
    y = jnp.dot(x_ref[...], w_ref[...], preferred_element_type=jnp.float32)
    o_ref[...] = (y + b_ref[...]).astype(o_ref.dtype)


def linear_bias(x, w, b, *, tm=256):
    n, d_in = x.shape
    d_out = w.shape[1]
    tm = min(tm, _round_up(n, 8))          # 8-aligned row tile
    n_pad = _round_up(n, tm)
    xp = jnp.pad(x, ((0, n_pad - n), (0, 0)))
    out = pl.pallas_call(
        _linear_bias_kernel,
        out_shape=jax.ShapeDtypeStruct((n_pad, d_out), x.dtype),
        grid=(n_pad // tm,),
        in_specs=[
            pl.BlockSpec((tm, d_in), lambda i: (i, 0)),
            pl.BlockSpec((d_in, d_out), lambda i: (0, 0)),   # weight VMEM-resident
            pl.BlockSpec((1, d_out), lambda i: (0, 0)),
        ],
        out_specs=pl.BlockSpec((tm, d_out), lambda i: (i, 0)),
        compiler_params=pltpu.CompilerParams(dimension_semantics=("parallel",)),
    )(xp, w, b.reshape(1, -1))
    return out[:n]


# ----------------------------------------------------------------------------
# Kernel 2: fused OutputLayer  Linear -> ReLU -> BertLayerNorm -> Linear
# ----------------------------------------------------------------------------
def _output_mlp_kernel(x_ref, w1_ref, b1_ref, g_ref, be_ref, w2_ref, b2_ref, o_ref, *, eps):
    h = jnp.dot(x_ref[...], w1_ref[...], preferred_element_type=jnp.float32)
    h = h + b1_ref[...]
    h = jnp.maximum(h, 0.0)                                   # ReLU
    u = jnp.mean(h, axis=-1, keepdims=True)                   # BertLayerNorm
    c = h - u
    v = jnp.mean(c * c, axis=-1, keepdims=True)
    h = c * jax.lax.rsqrt(v + eps)
    h = h * g_ref[...] + be_ref[...]
    # TODO(synk): trans_drop dropout between LN and the final Linear is identity
    # in eval mode; training would use pltpu.prng_seed + pltpu.stateful_bernoulli.
    y = jnp.dot(h.astype(w2_ref.dtype), w2_ref[...], preferred_element_type=jnp.float32)
    o_ref[...] = (y + b2_ref[...]).astype(o_ref.dtype)


def output_mlp(x, w1, b1, gamma, beta, w2, b2, *, eps=1e-12, tm=256):
    """OutputLayer on [N, d_in] rows, fused in a single pallas_call."""
    n, d_in = x.shape
    d_hid = w1.shape[1]
    d_out = w2.shape[1]
    # Lane-dense store: pad the tiny final projection up to 128 lanes, slice after.
    d_out_pad = max(128, _round_up(d_out, 128))
    w2p = jnp.zeros((d_hid, d_out_pad), w2.dtype).at[:, :d_out].set(w2)
    b2p = jnp.zeros((1, d_out_pad), b2.dtype).at[:, :d_out].set(b2.reshape(1, -1))

    tm = min(tm, _round_up(n, 8))          # v6e: prefer multiples of 256; v7x: halve if VMEM-tight
    n_pad = _round_up(n, tm)
    xp = jnp.pad(x, ((0, n_pad - n), (0, 0)))

    out = pl.pallas_call(
        partial(_output_mlp_kernel, eps=eps),
        out_shape=jax.ShapeDtypeStruct((n_pad, d_out_pad), x.dtype),
        grid=(n_pad // tm,),
        in_specs=[
            pl.BlockSpec((tm, d_in), lambda i: (i, 0)),
            pl.BlockSpec((d_in, d_hid), lambda i: (0, 0)),     # weights resident across the grid
            pl.BlockSpec((1, d_hid), lambda i: (0, 0)),
            pl.BlockSpec((1, d_hid), lambda i: (0, 0)),
            pl.BlockSpec((1, d_hid), lambda i: (0, 0)),
            pl.BlockSpec((d_hid, d_out_pad), lambda i: (0, 0)),
            pl.BlockSpec((1, d_out_pad), lambda i: (0, 0)),
        ],
        out_specs=pl.BlockSpec((tm, d_out_pad), lambda i: (i, 0)),
        compiler_params=pltpu.CompilerParams(dimension_semantics=("parallel",)),
    )(xp, w1, b1.reshape(1, -1), gamma.reshape(1, -1), beta.reshape(1, -1), w2p, b2p)
    return out[:n, :d_out]


# ----------------------------------------------------------------------------
# Kernel 3: span extraction (start/end bmm), one batch element per grid step
# ----------------------------------------------------------------------------
def _span_kernel(sm_ref, em_ref, xhi_ref, xlo_ref, so_ref, eo_ref):
    so_ref[0] = jnp.dot(sm_ref[0], xhi_ref[0],
                        preferred_element_type=jnp.float32).astype(so_ref.dtype)
    eo_ref[0] = jnp.dot(em_ref[0], xlo_ref[0],
                        preferred_element_type=jnp.float32).astype(eo_ref.dtype)


def span_state(start_map, end_map, x_hi, x_lo):
    b, m, l = start_map.shape
    h = x_hi.shape[-1]
    start_out, end_out = pl.pallas_call(
        _span_kernel,
        out_shape=(jax.ShapeDtypeStruct((b, m, h), x_hi.dtype),
                   jax.ShapeDtypeStruct((b, m, h), x_lo.dtype)),
        grid=(b,),
        in_specs=[
            pl.BlockSpec((1, m, l), lambda i: (i, 0, 0)),
            pl.BlockSpec((1, m, l), lambda i: (i, 0, 0)),
            pl.BlockSpec((1, l, h), lambda i: (i, 0, 0)),
            pl.BlockSpec((1, l, h), lambda i: (i, 0, 0)),
        ],
        out_specs=[
            pl.BlockSpec((1, m, h), lambda i: (i, 0, 0)),
            pl.BlockSpec((1, m, h), lambda i: (i, 0, 0)),
        ],
        compiler_params=pltpu.CompilerParams(dimension_semantics=("parallel",)),
    )(start_map, end_map, x_hi, x_lo)
    return jnp.concatenate([start_out, end_out], axis=-1)


# ----------------------------------------------------------------------------
# Kernel 4: fused GAT AttentionLayer (all heads, all edge types, q_attn=False)
# ----------------------------------------------------------------------------
def _gat_kernel(x_ref, xT_ref, adj_ref, maskT_ref, w_ref, wT_ref, a1_ref, a2_ref,
                o_ref, *, n_head, n_type, d_head, neg_slope):
    x = x_ref[0]                      # [E, D]
    xT = xT_ref[0]                    # [D, E]
    adj = adj_ref[0]                  # [E, E] float
    maskT = maskT_ref[0]              # [1, E]

    head_outs = []
    for hd in range(n_head):
        scores = jnp.zeros(adj.shape, jnp.float32)
        hT = None
        for t in range(n_type):
            w = w_ref[hd, t]          # [D, d_head]
            wT = wT_ref[hd, t]        # [d_head, D]
            a1 = a1_ref[hd, t]        # [1, d_head]
            a2 = a2_ref[hd, t]        # [d_head, 1]
            h = jnp.dot(x, w, preferred_element_type=jnp.float32)     # [E, d]
            hT = jnp.dot(wT, xT, preferred_element_type=jnp.float32)  # [d, E]
            # TODO(synk): gnn_drop dropout on h is identity in eval mode.
            f1 = jnp.sum(h * a1, axis=-1, keepdims=True)   # [E, 1]   (h_i . a1)
            f2 = jnp.sum(hT * a2, axis=0, keepdims=True)   # [1, E]   (h_j . a2)
            s = f1 + f2                                    # score[i, j]
            s = jnp.where(s > 0, s, neg_slope * s)         # LeakyReLU(0.2)
            scores = scores + jnp.where(adj == float(t + 1), s, 0.0)
        scores = jnp.where(adj > 0, scores, jnp.float32(-1e30))
        # softmax over dim=2 (j)
        m = jnp.max(scores, axis=-1, keepdims=True)
        e = jnp.exp(scores - m)
        coefs = e / jnp.sum(e, axis=-1, keepdims=True)     # [E, E]
        # node-mask the (last edge type's) h, aggregate over source nodes i:
        # out[j, :] = sum_i coefs[i, j] * h_masked[i, :]  -> computed transposed.
        hT_masked = hT * maskT
        outT = jnp.dot(hT_masked, coefs, preferred_element_type=jnp.float32)  # [d, E]
        head_outs.append(jnp.maximum(outT, 0.0))           # AttentionLayer ReLU
    o_ref[0] = jnp.concatenate(head_outs, axis=0).astype(o_ref.dtype)   # [hid, E]


def gat_attention_layer(graph_state, adj, node_mask, W, a, *, neg_slope=0.2):
    """AttentionLayer(in_dim=hid_dim) with q_attn=False, eval mode."""
    b, e, d = graph_state.shape
    n_head, n_type, _, d_head = W.shape
    hid = n_head * d_head
    xT = jnp.swapaxes(graph_state, 1, 2)            # [B, D, E]
    maskT = jnp.swapaxes(node_mask, 1, 2)           # [B, 1, E]
    WT = jnp.swapaxes(W, 2, 3)                      # [n_head, n_type, d_head, D]
    a1 = a[:, :, None, :d_head]                     # [n_head, n_type, 1, d_head]
    a2 = a[:, :, d_head:, None]                     # [n_head, n_type, d_head, 1]

    out_t = pl.pallas_call(
        partial(_gat_kernel, n_head=n_head, n_type=n_type, d_head=d_head,
                neg_slope=neg_slope),
        out_shape=jax.ShapeDtypeStruct((b, hid, e), graph_state.dtype),
        grid=(b,),
        in_specs=[
            pl.BlockSpec((1, e, d), lambda i: (i, 0, 0)),
            pl.BlockSpec((1, d, e), lambda i: (i, 0, 0)),
            pl.BlockSpec((1, e, e), lambda i: (i, 0, 0)),
            pl.BlockSpec((1, 1, e), lambda i: (i, 0, 0)),
            pl.BlockSpec((n_head, n_type, d, d_head), lambda i: (0, 0, 0, 0)),
            pl.BlockSpec((n_head, n_type, d_head, d), lambda i: (0, 0, 0, 0)),
            pl.BlockSpec((n_head, n_type, 1, d_head), lambda i: (0, 0, 0, 0)),
            pl.BlockSpec((n_head, n_type, d_head, 1), lambda i: (0, 0, 0, 0)),
        ],
        out_specs=pl.BlockSpec((1, hid, e), lambda i: (i, 0, 0)),
        compiler_params=pltpu.CompilerParams(dimension_semantics=("parallel",)),
    )(graph_state, xT, adj, maskT, W, WT, a1, a2)
    return jnp.swapaxes(out_t, 1, 2)                # [B, E, hid]


# ----------------------------------------------------------------------------
# GraphBlock parameters + forward (Pallas hot path, plain-JAX glue)
# ----------------------------------------------------------------------------
def init_graph_block_params(key, cfg):
    h = cfg["hidden_dim"]
    d2 = 2 * h                                   # node feature dim (q_update=False)
    n_head = cfg["num_gnn_heads"]
    n_type = cfg["num_edge_type"]
    d_head = d2 // n_head
    ks = jax.random.split(key, 8)

    def xavier(k, shape, gain=1.414):
        fan_in, fan_out = shape[-2], shape[-1]
        bound = gain * math.sqrt(6.0 / (fan_in + fan_out))
        return jax.random.uniform(k, shape, minval=-bound, maxval=bound, dtype=jnp.float32)

    def linear_init(k, d_in, d_out):
        kw, kb = jax.random.split(k)
        bound = 1.0 / math.sqrt(d_in)
        w = jax.random.uniform(kw, (d_in, d_out), minval=-bound, maxval=bound, dtype=jnp.float32)
        b = jax.random.uniform(kb, (d_out,), minval=-bound, maxval=bound, dtype=jnp.float32)
        return w, b

    def output_layer_init(k, d_in, num_answer=1):
        k1, k2 = jax.random.split(k)
        w1, b1 = linear_init(k1, d_in, 2 * d_in)
        gamma = jnp.ones((2 * d_in,), jnp.float32)
        beta = jnp.zeros((2 * d_in,), jnp.float32)
        w2, b2 = linear_init(k2, 2 * d_in, num_answer)
        return (w1, b1, gamma, beta, w2, b2)

    gat_lin_w, gat_lin_b = linear_init(ks[0], cfg["input_dim"], d2)
    gat_w = xavier(ks[1], (n_head, n_type, d2, d_head))
    gat_a = xavier(ks[2], (n_head, n_type, 2 * d_head, 1)).reshape(n_head, n_type, 2 * d_head)
    return dict(
        gat_linear_w=gat_lin_w, gat_linear_b=gat_lin_b,
        gat_W=gat_w, gat_a=gat_a,
        sent_mlp=output_layer_init(ks[3], d2),
        entity_mlp=output_layer_init(ks[4], d2),
    )


def graph_block_forward(params, batch, input_state, query_vec, cfg):
    """GraphBlock.forward (eval mode, q_update=False, q_attn=False)."""
    h = cfg["hidden_dim"]
    b = input_state.shape[0]
    # Read (but unused) keys, mirroring the torch forward.
    _ = (batch["context_lens"], batch["context_mask"], batch["sent_mapping"],
         batch["para_mapping"], batch["ent_mapping"])

    x_lo = input_state[:, :, :h]        # paired with *_end_mapping
    x_hi = input_state[:, :, h:]        # paired with *_start_mapping

    para_state = span_state(batch["para_start_mapping"], batch["para_end_mapping"], x_hi, x_lo)
    sent_state = span_state(batch["sent_start_mapping"], batch["sent_end_mapping"], x_hi, x_lo)
    ent_state = span_state(batch["ent_start_mapping"], batch["ent_end_mapping"], x_hi, x_lo)
    p, s, ent = para_state.shape[1], sent_state.shape[1], ent_state.shape[1]

    # q_update == False branch:  gat_linear projects the query vector.
    # TODO(synk): q_update=True branch (gat_linear over concatenated node states) not implemented.
    q_proj = linear_bias(query_vec, params["gat_linear_w"], params["gat_linear_b"])
    graph_state = jnp.concatenate([q_proj[:, None, :], para_state, sent_state, ent_state], axis=1)
    node_mask = jnp.concatenate(
        [jnp.ones((b, 1), graph_state.dtype), batch["para_mask"],
         batch["sent_mask"], batch["ent_mask"]], axis=-1)[..., None]
    adj = batch["graphs"]
    assert adj.shape[1] == node_mask.shape[1]

    # TODO(synk): q_attn=True query-gating (qattn_W1/W2 sigmoid gate) not implemented.
    graph_state = gat_attention_layer(graph_state, adj, node_mask,
                                      params["gat_W"], params["gat_a"], neg_slope=0.2)

    n_gat = 1 + p + s
    ent_nodes = graph_state[:, n_gat:, :]
    d2 = graph_state.shape[-1]

    gat_logit = output_mlp(graph_state[:, :n_gat, :].reshape(b * n_gat, d2),
                           *params["sent_mlp"]).reshape(b, n_gat, -1)
    para_logit = gat_logit[:, 1:1 + p, :]
    sent_logit = gat_logit[:, 1 + p:, :]
    query_vec_out = graph_state[:, 0, :]
    ent_logit = output_mlp(ent_nodes.reshape(b * ent, d2),
                           *params["entity_mlp"]).reshape(b, ent)
    ent_logit = ent_logit - 1e30 * (1.0 - batch["ans_cand_mask"])

    para_prediction = jnp.concatenate(
        [jnp.zeros((b, p, 1), para_logit.dtype), para_logit], axis=-1)
    sent_prediction = jnp.concatenate(
        [jnp.zeros((b, s, 1), sent_logit.dtype), sent_logit], axis=-1)

    return (input_state, graph_state, node_mask, sent_state, query_vec_out,
            para_logit, para_prediction, sent_logit, sent_prediction, ent_logit)


# ----------------------------------------------------------------------------
# Pure-JAX reference (faithful to the torch code) for the sanity check
# ----------------------------------------------------------------------------
def _leaky(x, slope=0.2):
    return jnp.where(x > 0, x, slope * x)


def _output_layer_ref(x, w1, b1, g, be, w2, b2, eps=1e-12):
    y = x @ w1 + b1
    y = jnp.maximum(y, 0.0)
    u = jnp.mean(y, axis=-1, keepdims=True)
    v = jnp.mean((y - u) ** 2, axis=-1, keepdims=True)
    y = (y - u) / jnp.sqrt(v + eps)
    y = g * y + be
    return y @ w2 + b2


def graph_block_reference(params, batch, input_state, query_vec, cfg):
    h = cfg["hidden_dim"]
    n_head = cfg["num_gnn_heads"]
    n_type = cfg["num_edge_type"]
    b = input_state.shape[0]
    x_lo = input_state[:, :, :h]
    x_hi = input_state[:, :, h:]
    bmm = lambda a, x: jnp.einsum("bml,bld->bmd", a, x)

    para_state = jnp.concatenate([bmm(batch["para_start_mapping"], x_hi),
                                  bmm(batch["para_end_mapping"], x_lo)], -1)
    sent_state = jnp.concatenate([bmm(batch["sent_start_mapping"], x_hi),
                                  bmm(batch["sent_end_mapping"], x_lo)], -1)
    ent_state = jnp.concatenate([bmm(batch["ent_start_mapping"], x_hi),
                                 bmm(batch["ent_end_mapping"], x_lo)], -1)

    q_proj = query_vec @ params["gat_linear_w"] + params["gat_linear_b"]
    graph_state = jnp.concatenate([q_proj[:, None, :], para_state, sent_state, ent_state], 1)
    node_mask = jnp.concatenate(
        [jnp.ones((b, 1), graph_state.dtype), batch["para_mask"],
         batch["sent_mask"], batch["ent_mask"]], -1)[..., None]
    adj = batch["graphs"]
    e_nodes = graph_state.shape[1]

    heads = []
    for hd in range(n_head):
        scores = jnp.zeros_like(adj)
        hh = None
        for t in range(n_type):
            hh = jnp.einsum("bed,df->bef", graph_state, params["gat_W"][hd, t])
            a_vec = params["gat_a"][hd, t]
            d = hh.shape[-1]
            h_i = jnp.broadcast_to(hh[:, :, None, :], (b, e_nodes, e_nodes, d))
            h_j = jnp.broadcast_to(hh[:, None, :, :], (b, e_nodes, e_nodes, d))
            a_in = jnp.concatenate([h_i, h_j], -1)
            score = _leaky(jnp.einsum("bijk,k->bij", a_in, a_vec))
            scores = scores + jnp.where(adj == (t + 1), score, 0.0)
        scores = jnp.where(adj > 0, scores, -1e30)
        hh = hh * node_mask
        coefs = jax.nn.softmax(scores, axis=2)
        heads.append(jnp.einsum("bij,bid->bjd", coefs, hh))
    graph_state = jnp.maximum(jnp.concatenate(heads, -1), 0.0)

    p, s, ent = para_state.shape[1], sent_state.shape[1], ent_state.shape[1]
    n_gat = 1 + p + s
    gat_logit = _output_layer_ref(graph_state[:, :n_gat, :], *params["sent_mlp"])
    para_logit = gat_logit[:, 1:1 + p, :]
    sent_logit = gat_logit[:, 1 + p:, :]
    query_vec_out = graph_state[:, 0, :]
    ent_logit = _output_layer_ref(graph_state[:, n_gat:, :], *params["entity_mlp"]).reshape(b, -1)
    ent_logit = ent_logit - 1e30 * (1.0 - batch["ans_cand_mask"])
    para_prediction = jnp.concatenate([jnp.zeros((b, p, 1), para_logit.dtype), para_logit], -1)
    sent_prediction = jnp.concatenate([jnp.zeros((b, s, 1), sent_logit.dtype), sent_logit], -1)
    return (input_state, graph_state, node_mask, sent_state, query_vec_out,
            para_logit, para_prediction, sent_logit, sent_prediction, ent_logit)


# ----------------------------------------------------------------------------
if __name__ == "__main__":
    cfg = dict(hidden_dim=32, input_dim=64, num_gnn_heads=2, num_edge_type=3,
               q_update=False)
    B, L, P, S, ENT = 2, 32, 3, 6, 5
    E = 1 + P + S + ENT
    H = cfg["hidden_dim"]

    key = jax.random.PRNGKey(0)
    ks = jax.random.split(key, 16)

    input_state = jax.random.normal(ks[0], (B, L, 2 * H), jnp.float32)
    query_vec = jax.random.normal(ks[1], (B, cfg["input_dim"]), jnp.float32)

    def one_hot_map(k, m):
        idx = jax.random.randint(k, (B, m), 0, L)
        return jax.nn.one_hot(idx, L, dtype=jnp.float32)

    batch = {
        # read but unused by the forward (kept for interface fidelity)
        "context_lens": jnp.full((B,), L, jnp.int32),
        "context_mask": jnp.ones((B, L), jnp.float32),
        "sent_mapping": jnp.zeros((B, L, S), jnp.float32),
        "para_mapping": jnp.zeros((B, L, P), jnp.float32),
        "ent_mapping": jnp.zeros((B, L, ENT), jnp.float32),
        # used
        "para_start_mapping": one_hot_map(ks[2], P),
        "para_end_mapping": one_hot_map(ks[3], P),
        "sent_start_mapping": one_hot_map(ks[4], S),
        "sent_end_mapping": one_hot_map(ks[5], S),
        "ent_start_mapping": one_hot_map(ks[6], ENT),
        "ent_end_mapping": one_hot_map(ks[7], ENT),
        "para_mask": (jax.random.uniform(ks[8], (B, P)) > 0.2).astype(jnp.float32),
        "sent_mask": (jax.random.uniform(ks[9], (B, S)) > 0.2).astype(jnp.float32),
        "ent_mask": (jax.random.uniform(ks[10], (B, ENT)) > 0.2).astype(jnp.float32),
        "graphs": jax.random.randint(ks[11], (B, E, E), 0,
                                     cfg["num_edge_type"] + 1).astype(jnp.float32),
        "ans_cand_mask": (jax.random.uniform(ks[12], (B, ENT)) > 0.3).astype(jnp.float32),
    }

    params = init_graph_block_params(ks[13], cfg)

    outs = graph_block_forward(params, batch, input_state, query_vec, cfg)
    outs = jax.block_until_ready(outs)

    refs = graph_block_reference(params, batch, input_state, query_vec, cfg)
    names = ["input_state", "graph_state", "node_mask", "sent_state", "query_vec",
             "para_logit", "para_prediction", "sent_logit", "sent_prediction", "ent_logit"]
    for name, o, r in zip(names, outs, refs):
        assert o.shape == r.shape, (name, o.shape, r.shape)
        assert jnp.allclose(o, r, atol=2e-3, rtol=2e-3), f"mismatch vs reference: {name}"

    print("KERNEL_OK")
</pallas_src>

<mosaic_0001>
module attributes {stable_mosaic.version = 11 : i64} {
  func.func @_span_kernel(%arg0: i32, %arg1: memref<1x3x32xf32, #tpu.memory_space<vmem>>, %arg2: memref<1x3x32xf32, #tpu.memory_space<vmem>>, %arg3: memref<1x32x32xf32, #tpu.memory_space<vmem>>, %arg4: memref<1x32x32xf32, #tpu.memory_space<vmem>>, %arg5: memref<1x3x32xf32, #tpu.memory_space<vmem>>, %arg6: memref<1x3x32xf32, #tpu.memory_space<vmem>>) attributes {dimension_semantics = [#tpu.dimension_semantics<parallel>], iteration_bounds = array<i64: 2>, scalar_prefetch = 0 : i64, scratch_operands = 0 : i64, tpu.core_type = #tpu.core_type<tc>, window_params = [{transform_indices = @transform_0, window_bounds = array<i64: 1, 3, 32>}, {transform_indices = @transform_1, window_bounds = array<i64: 1, 3, 32>}, {transform_indices = @transform_2, window_bounds = array<i64: 1, 32, 32>}, {transform_indices = @transform_3, window_bounds = array<i64: 1, 32, 32>}, {transform_indices = @transform_4, window_bounds = array<i64: 1, 3, 32>}, {transform_indices = @transform_5, window_bounds = array<i64: 1, 3, 32>}]} {
    %c0 = arith.constant 0 : index
    %c0_0 = arith.constant 0 : index
    %c0_1 = arith.constant 0 : index
    %0 = vector.load %arg1[%c0, %c0_0, %c0_1] : memref<1x3x32xf32, #tpu.memory_space<vmem>>, vector<1x3x32xf32>
    %1 = vector.shape_cast %0 : vector<1x3x32xf32> to vector<3x32xf32>
    %c0_2 = arith.constant 0 : index
    %c0_3 = arith.constant 0 : index
    %c0_4 = arith.constant 0 : index
    %2 = vector.load %arg3[%c0_2, %c0_3, %c0_4] : memref<1x32x32xf32, #tpu.memory_space<vmem>>, vector<1x32x32xf32>
    %3 = vector.shape_cast %2 : vector<1x32x32xf32> to vector<32x32xf32>
    %cst = arith.constant dense<0.000000e+00> : vector<3x32xf32>
    %4 = tpu.matmul %1, %3, %cst {dimension_numbers = #tpu.dot_dimension_numbers<[1], [0], [0], [1], [0, 0, 1, 1], [], []>} : vector<3x32xf32>, vector<32x32xf32>, vector<3x32xf32> -> vector<3x32xf32>
    %c0_5 = arith.constant 0 : index
    %c0_6 = arith.constant 0 : index
    %c0_7 = arith.constant 0 : index
    %5 = vector.load %arg5[%c0_5, %c0_6, %c0_7] : memref<1x3x32xf32, #tpu.memory_space<vmem>>, vector<1x3x32xf32>
    %6 = vector.shape_cast %5 : vector<1x3x32xf32> to vector<3x32xf32>
    %7 = vector.shape_cast %4 : vector<3x32xf32> to vector<1x3x32xf32>
    tpu.vector_store %arg5[%c0_5, %c0_6, %c0_7], %7 {strides = array<i32>} : memref<1x3x32xf32, #tpu.memory_space<vmem>>, vector<1x3x32xf32>,
    %c0_8 = arith.constant 0 : index
    %c0_9 = arith.constant 0 : index
    %c0_10 = arith.constant 0 : index
    %8 = vector.load %arg2[%c0_8, %c0_9, %c0_10] : memref<1x3x32xf32, #tpu.memory_space<vmem>>, vector<1x3x32xf32>
    %9 = vector.shape_cast %8 : vector<1x3x32xf32> to vector<3x32xf32>
    %c0_11 = arith.constant 0 : index
    %c0_12 = arith.constant 0 : index
    %c0_13 = arith.constant 0 : index
    %10 = vector.load %arg4[%c0_11, %c0_12, %c0_13] : memref<1x32x32xf32, #tpu.memory_space<vmem>>, vector<1x32x32xf32>
    %11 = vector.shape_cast %10 : vector<1x32x32xf32> to vector<32x32xf32>
    %cst_14 = arith.constant dense<0.000000e+00> : vector<3x32xf32>
    %12 = tpu.matmul %9, %11, %cst_14 {dimension_numbers = #tpu.dot_dimension_numbers<[1], [0], [0], [1], [0, 0, 1, 1], [], []>} : vector<3x32xf32>, vector<32x32xf32>, vector<3x32xf32> -> vector<3x32xf32>
    %c0_15 = arith.constant 0 : index
    %c0_16 = arith.constant 0 : index
    %c0_17 = arith.constant 0 : index
    %13 = vector.load %arg6[%c0_15, %c0_16, %c0_17] : memref<1x3x32xf32, #tpu.memory_space<vmem>>, vector<1x3x32xf32>
    %14 = vector.shape_cast %13 : vector<1x3x32xf32> to vector<3x32xf32>
    %15 = vector.shape_cast %12 : vector<3x32xf32> to vector<1x3x32xf32>
    tpu.vector_store %arg6[%c0_15, %c0_16, %c0_17], %15 {strides = array<i32>} : memref<1x3x32xf32, #tpu.memory_space<vmem>>, vector<1x3x32xf32>,
    return
  }
  func.func @transform_0(%arg0: i32) -> (i32, i32, i32) {
    %c0_i32 = arith.constant 0 : i32
    %c0_i32_0 = arith.constant 0 : i32
    %c0_i32_1 = arith.constant 0 : i32
    return %arg0, %c0_i32, %c0_i32_0 : i32, i32, i32
  }
  func.func @transform_1(%arg0: i32) -> (i32, i32, i32) {
    %c0_i32 = arith.constant 0 : i32
    %c0_i32_0 = arith.constant 0 : i32
    %c0_i32_1 = arith.constant 0 : i32
    return %arg0, %c0_i32, %c0_i32_0 : i32, i32, i32
  }
  func.func @transform_2(%arg0: i32) -> (i32, i32, i32) {
    %c0_i32 = arith.constant 0 : i32
    %c0_i32_0 = arith.constant 0 : i32
    %c0_i32_1 = arith.constant 0 : i32
    return %arg0, %c0_i32, %c0_i32_0 : i32, i32, i32
  }
  func.func @transform_3(%arg0: i32) -> (i32, i32, i32) {
    %c0_i32 = arith.constant 0 : i32
    %c0_i32_0 = arith.constant 0 : i32
    %c0_i32_1 = arith.constant 0 : i32
    return %arg0, %c0_i32, %c0_i32_0 : i32, i32, i32
  }
  func.func @transform_4(%arg0: i32) -> (i32, i32, i32) {
    %c0_i32 = arith.constant 0 : i32
    %c0_i32_0 = arith.constant 0 : i32
    %c0_i32_1 = arith.constant 0 : i32
    return %arg0, %c0_i32, %c0_i32_0 : i32, i32, i32
  }
  func.func @transform_5(%arg0: i32) -> (i32, i32, i32) {
    %c0_i32 = arith.constant 0 : i32
    %c0_i32_0 = arith.constant 0 : i32
    %c0_i32_1 = arith.constant 0 : i32
    return %arg0, %c0_i32, %c0_i32_0 : i32, i32, i32
  }
}

</mosaic_0001>

<bundles_post_ra>
// kernel: tpu_custom_call.1
= control target key start
LH: loop header
LB: loop body
LE: loop exit
PB: predicated region body
PF: predicated region fallthrough
CT: control target
= control target key end

     0   :  { %11 = vsyncpa [#allocation3], 0  ;;  %s1060_s0 = inlined_call_operand.vmem [shape: f32[2,3,32], index: 0, kind: input, shape index: {}]   ;;  %s1061_s1 = inlined_call_operand.vmem [shape: f32[2,3,32], index: 1, kind: input, shape index: {}]   ;;  %s1062_s2 = inlined_call_operand.hbm [shape: f32[2,32,32], index: 2, kind: input, shape index: {}]   ;;  %s1063_s3 = inlined_call_operand.hbm [shape: f32[2,32,32], index: 3, kind: input, shape index: {}]   ;;  %s1064_s4 = inlined_call_operand.vmem [shape: f32[2,3,32], index: 4, kind: output, shape index: {0}]   ;;  %s1065_s5 = inlined_call_operand.vmem [shape: f32[2,3,32], index: 5, kind: output, shape index: {1}]  }
   0x1   :  { %13 = vsyncpa [#allocation3 + $0x1], 0 }
   0x2   :  { %14 = vsyncpa [#allocation5], 0 }
   0x3   :  { %16 = vsyncpa [#allocation5 + $0x1], 0  ;;  %s883_s18 = smov 0   ;;  %s885_s19 = smov 0  }
   0x4   :  { %s887_s20 = smov 0   ;;  %s889_s21 = smov 0  }
   0x5 LB: > { %s902_s22 = sadd.s32 4294967295, %s844_s21   ;;  %s905_s23 = sadd.s32 1, %s844_s21   ;;  %s844_s21 = sphi %s889_s21, %s1075_s21   ;;  %s840_s20 = sphi %s887_s20, %s1074_s20   ;;  %s836_s19 = sphi %s885_s19, %s1073_s19   ;;  %s832_s18 = sphi %s883_s18, %s1072_s18  }
   0x6   : > { %s78_s24 = ssub.s32 %s844_s21, %s905_s23  ;;  %s81_s25 = sadd.s32 1, %s840_s20 }
   0x7   : > { %p79_p0 = scmp.eq.s32.totalorder %s78_s24, 0  ;;  %p88_p1 = scmp.ne.s32.totalorder %s840_s20, %s836_s19 }
   0x8   : > { %p89_p2 = scmp.eq.s32.totalorder %s844_s21, 0  ;;  %p94_p3 = scmp.ne.s32.totalorder %s836_s19, %s832_s18 }
   0x9   : > { %s915_s26 = scalar_select %p79_p0, %s840_s20, %s81_s25  }
   0xa   : > { %p90_p4 = por %p89_p2, %p88_p1  ;;  %p95_p5 = scmp.eq.s32.totalorder %s902_s22, 0 }
   0xb   : > { %p708_p6 = scmp.lt.s32.totalorder %s844_s21, 2  ;;  %s924_s28 = sand.u32 1, %s840_s20  }
   0xc   : > { %p919_p7 = por %p95_p5, %p94_p3  ;;  %s634_s29 = sshll.u32 %s924_s28, 5 }
   0xd   : > { %s651_s30 = sshll.u32 %s844_s21, 9  ;;  %s214_s9 = scalar_lea.vmem [#allocation2], %s634_s29 }
   0xe   : > { %s1067_s27 = scalar_select %p919_p7, 1, 0 }
   0xf   : > { %s933_s8 = scalar_lea.hbm %s1062_s2, %s651_s30  ;;  %s221_s10 = sshll.u32 %s214_s9, 4  ;;  %s937_s10 = int_to_ptr.vmem [resolvable:$true] %s221_s10 }
  0x10   : > { %p939_p8 = pnand %p708_p6, %p90_p4  ;;  %s211_s12 = scalar_lea.sflag [#allocation3], %s924_s28 }
  0x11   : > { %s746_s13 = scalar_lea.hbm %s933_s8, 512  ;;  %s751_s16 = scalar_lea.hbm %s1062_s2, 1024 }
  0x12   : > { %p747_p10 = scmp.ne.s32.totalorder %s933_s8, %s746_s13  ;;  %p748_p11 = pneg %p939_p8 }
  0x13   : > { %p752_p0 = scmp.lt.u32.totalorder %s933_s8, %s1062_s2  ;;  %p753_p1 = scmp.lt.u32.totalorder %s751_s16, %s746_s13 }
  0x14   : > { %p749_p12 = pnand %p748_p11, %p747_p10  ;;  %p755_p3 = scmp.lt.u32.totalorder %s746_s13, %s933_s8 }
  0x15   : > { %p754_p2 = por %p753_p1, %p752_p0 }
  0x16   : > { %p750_p13 = pneg %p749_p12 }
  0x17   : > { %p756_p4 = por %p755_p3, %p754_p2 }
  0x19   : > { %p757_p5 = pnand %p756_p4, %p750_p13 }
  0x1b   : > { %760 = shalt.err (!%p757_p5)
}
  0x1c   : > { %s761_s24 = scalar_lea.vmem %s937_s10, 512  ;;  %s846_s25 = smov [#allocation2]  }
  0x1d   : > { %p762_p6 = scmp.ne.s32.totalorder %s937_s10, %s761_s24  ;;  %s766_s6 = sshll.u32 %s846_s25, 4  ;;  %s767_s6 = int_to_ptr.vmem [resolvable:$false] %s766_s6 }
  0x1e   : > { %s768_s7 = scalar_lea.vmem %s767_s6, 1024  ;;  %p769_p9 = scmp.lt.s32.totalorder %s937_s10, %s767_s6 }
  0x1f   : > { %p764_p10 = pnand %p762_p6, %p748_p11  ;;  %p770_p0 = scmp.lt.s32.totalorder %s768_s7, %s761_s24 }
  0x21   : > { %p765_p12 = pneg %p764_p10  ;;  %p771_p1 = por %p770_p0, %p769_p9 }
  0x23   : > { %p772_p2 = pnand %p771_p1, %p765_p12 }
  0x25   : > { %775 = shalt.err (!%p772_p2)
}
  0x26   : > { %s847_s9 = smov 128   ;;  %s848_s13 = smov 8  }
  0x27   : > { %704 = dma.hbm_to_vmem [thread:$0]  (!%p939_p8), %s933_s8, 512, %s937_s10, %s211_s12, %s847_s9, %s847_s9, %s848_s13  }
  0x28   : > { %p250_p9 = scmp.lt.s32.totalorder %s844_s21, 3  ;;  %s981_s16 = scalar_lea.hbm %s1063_s3, %s651_s30 }
  0x29   : > { %p1069_p13 = scmp.ge.s32.totalorder %s844_s21, 1  ;;  %s235_s18 = scalar_lea.vmem [#allocation4], %s634_s29 }
  0x2a   : > { %s242_s24 = sshll.u32 %s235_s18, 4  ;;  %s232_s8 = scalar_lea.sflag [#allocation5], %s924_s28  ;;  %s991_s24 = int_to_ptr.vmem [resolvable:$true] %s242_s24 }
  0x2b   : > { %p985_p3 = pnand %p1069_p13, %p250_p9  ;;  %s776_s10 = scalar_lea.hbm %s981_s16, 512 }
  0x2c   : > { %p777_p4 = scmp.ne.s32.totalorder %s981_s16, %s776_s10  ;;  %s781_s12 = scalar_lea.hbm %s1063_s3, 1024 }
  0x2d   : > { %p782_p10 = scmp.lt.u32.totalorder %s981_s16, %s1063_s3  ;;  %p783_p12 = scmp.lt.u32.totalorder %s781_s12, %s776_s10 }
  0x2e   : > { %p779_p5 = pnand %p777_p4, %p748_p11  ;;  %p785_p1 = scmp.lt.u32.totalorder %s776_s10, %s981_s16 }
  0x2f   : > { %p784_p0 = por %p783_p12, %p782_p10 }
  0x30   : > { %p780_p6 = pneg %p779_p5 }
  0x31   : > { %p786_p2 = por %p785_p1, %p784_p0 }
  0x33   : > { %p787_p9 = pnand %p786_p2, %p780_p6 }
  0x35   : > { %790 = shalt.err (!%p787_p9)
}
  0x36   : > { %s791_s29 = scalar_lea.vmem %s991_s24, 512  ;;  %s849_s7 = smov [#allocation4]  }
  0x37   : > { %p792_p13 = scmp.ne.s32.totalorder %s991_s24, %s791_s29  ;;  %s796_s14 = sshll.u32 %s849_s7, 4  ;;  %s797_s14 = int_to_ptr.vmem [resolvable:$false] %s796_s14 }
  0x38   : > { %s798_s15 = scalar_lea.vmem %s797_s14, 1024  ;;  %p799_p7 = scmp.lt.s32.totalorder %s991_s24, %s797_s14 }
  0x39   : > { %p794_p4 = pnand %p792_p13, %p748_p11  ;;  %p800_p10 = scmp.lt.s32.totalorder %s798_s15, %s791_s29 }
  0x3b   : > { %p795_p5 = pneg %p794_p4  ;;  %p801_p12 = por %p800_p10, %p799_p7 }
  0x3d   : > { %p802_p0 = pnand %p801_p12, %p795_p5 }
  0x3f   : > { %805 = shalt.err (!%p802_p0)
}
  0x40   : > { %707 = dma.hbm_to_vmem [thread:$0]  (!%p939_p8), %s981_s16, 512, %s991_s24, %s232_s8, %s847_s9, %s847_s9, %s848_s13  }
  0x41   : > { %254 = sbr.rel (%p985_p3) target bundleno = 300 (0x12c), region = 36  ;;  %s256_s18 = sand.u32 (!%p985_p3), 1, %s836_s19  }
  0x42   : > { %s641_s10 = sshll.u32 (!%p985_p3), %s256_s18, 5  ;;  %s257_s21 = scalar_lea.sflag (!%p985_p3), [#allocation3], %s256_s18 }
  0x43   : > { %s260_s30 = scalar_lea.vmem (!%p985_p3), [#allocation2], %s641_s10  ;;  %p1071_p7 = scmp.ne.s32.totalorder (!%p985_p3), %s1067_s27, 0 }
  0x48   : > { %823 = dma.done.wait (%p1071_p7), %s257_s21, 512  }
  0x49   : > { %825 = vsyncadd (%p1071_p7), %s257_s21, 4294966784  ;;  %s266_s11 = scalar_lea.sflag [#allocation5], %s256_s18  ;;  %s269_s28 = scalar_lea.vmem [#allocation4], %s641_s10 }
  0x4a   : > { %827 = dma.done.wait (%p1071_p7), %s266_s11, 512  }
  0x4b   : > { %829 = vsyncadd (%p1071_p7), %s266_s11, 4294966784  ;;  %p312_p8 = scmp.lt.s32.totalorder %s902_s22, 1  ;;  %v850_v0 = vmov 0.0|0.0   ;;  %vm851_vm0 = vmmov 0   ;;  %v852_v1 = vmov 0.0   ;;  %v329_v2 = vld [vmem:[%s260_s30] sm:$0xff] }
  0x4c   : > { %685 = vmatprep.subr.bf16.mxu0 %v850_v0  ;;  %691 = vmatprep.subr.bf16.mxu1 %v850_v0  ;;  %v330_v3 = vld [vmem:[%s260_s30 + $0x8] sm:$0xff]  ;;  %v410_v4 = vld [vmem:[%s269_s28] sm:$0xff]  ;;  %v331_v7 = vld [vmem:[%s260_s30 + $0x10] sm:$0xff]  ;;  %vm333_vm1 = vcmask 261120   ;;  %vm407_vm2 = vcmask 256000  }
  0x4d   : > { %671 = vmatprep.mubr.msk.f32.mxu0 %vm851_vm0, %v852_v1  ;;  %682 = vmatprep.mubr.msk.f32.mxu1 %vm851_vm0, %v852_v1  ;;  %s1077_s22 = smov (!%p312_p8, %s902_s22), 1  ;;  %v686_v5 = vpack.c.bf16 %v330_v3, %v329_v2  ;;  %v411_v6 = vld [vmem:[%s269_s28 + $0x8] sm:$0xff]  ;;  %v332_v8 = vld [vmem:[%s260_s30 + $0x18] sm:$0xff]  ;;  %v412_v10 = vld [vmem:[%s269_s28 + $0x10] sm:$0xff] }
  0x4e   : > { %s643_s27 = sshll.u32 %s1077_s22, 2  ;;  %v692_v9 = vpack.c.bf16 %v411_v6, %v410_v4  ;;  %v413_v11 = vld [vmem:[%s269_s28 + $0x18] sm:$0xff]  ;;  %v689_v12 = vpack.c.bf16 %v332_v8, %v331_v7 }
  0x4f   : > { %687 = vmatpush3.bf16.msra.mxu0 %v686_v5  ;;  %v695_v13 = vpack.c.bf16 %v413_v11, %v412_v10  ;;  %s315_s16 = scalar_lea.vmem %s1060_s0, %s643_s27  ;;  %s319_s8 = scalar_lea.vmem %s1061_s1, %s643_s27 }
  0x50   : > { %693 = vmatpush3.bf16.msra.mxu1 %v692_v9  ;;  %688 = vmatprep.subr.bf16.mxu0 %v850_v0  ;;  %v328_v14 = vld [vmem:[%s315_s16] sm:$0x7]  ;;  %s323_s25 = scalar_lea.vmem %s1064_s4, %s643_s27  ;;  %s327_s7 = scalar_lea.vmem %s1065_s5, %s643_s27 }
  0x51   : > { %694 = vmatprep.subr.bf16.mxu1 %v850_v0  ;;  %v409_v15 = vld [vmem:[%s319_s8] sm:$0x7] }
  0x53   : > { %690 = vmatpush3.bf16.msra.mxu0 %v689_v12 }
  0x54   : > { %696 = vmatpush3.bf16.msra.mxu1 %v695_v13 }
  0x56   : > { %672 = vmatmul.mubr.msk.f32.vlgmr.msra.gmra.mrb[0].mxu0 %vm333_vm1, %v328_v14 }
  0x57   : > { %683 = vmatmul.mubr.msk.f32.vlgmr.msra.gmra.mrb[0].mxu1 %vm333_vm1, %v409_v15 }
 0x129   : > { %v403_v16 = vpop.f32.mrb[0].mxu0 }
 0x12a   : > { %408 = vst.msk [vmem:[%s323_s25] sm:$0x7] %vm407_vm2, %v403_v16  ;;  %v483_v17 = vpop.f32.mrb[0].mxu1  ;;  %v673_v18 = vpop.f32.mrb[1].mxu0 }
 0x12b   : > { %487 = vst.msk [vmem:[%s327_s7] sm:$0x7] %vm407_vm2, %v483_v17  ;;  %v684_v19 = vpop.f32.mrb[1].mxu1 }
 0x12c PF: > { %p19_p11 = scmp.ge.s32.totalorder %s905_s23, 4   ;;  %s1072_s18 = smov %s836_s19 }
 0x12d   : > { %s1073_s19 = smov %s840_s20  ;;  %s1074_s20 = smov %s915_s26 }
 0x12e   : > { %s1075_s21 = smov %s905_s23  ;;  %21 = sbr.rel (!%p19_p11) target bundleno = 5 (0x5), region = 107 }
 0x135   :  { %521 = vsyncpa [#allocation3], 1 }
 0x136   :  { %523 = vsyncpa [#allocation3 + $0x1], 1 }
 0x137   :  { %524 = vsyncpa [#allocation5], 1 }
 0x138   :  { %526 = vsyncpa [#allocation5 + $0x1], 1 }

</bundles_post_ra>
